<compile_context>
chip_gen: v7x
topology: tpu7x:2x2x1
jax: 0.10.0
libtpu: 0.0.40
codegen_flags: <defaults>
</compile_context>

<pallas_src>
import jax
import jax.numpy as jnp
from jax.experimental import pallas as pl
from jax.experimental.pallas import tpu as pltpu

D_IN = 28 * 28       # 784
D_IN_PAD = 896       # 7 * 128, lane-aligned K for fc1
HIDDEN = 128
D_OUT = 10
D_OUT_PAD = 128      # lane-dense logits slab


def _round_up(n, m):
    return ((n + m - 1) // m) * m


def mlp_kernel(x_ref, w1_ref, b1_ref, w2_ref, b2_ref, out_ref, feat_ref):
    # fc1: (TB, 896) @ (896, 128), f32 accumulation on the MXU.
    feat = jnp.dot(x_ref[...], w1_ref[...],
                   preferred_element_type=jnp.float32) + b1_ref[...]
    feat_ref[...] = feat.astype(feat_ref.dtype)

    # ReLU (+ identity dropout, eval mode) in f32 on the VPU.
    h = jnp.maximum(feat, 0.0)

    # fc2: (TB, 128) @ (128, 128-padded) -> lane-dense logits slab.
    logits = jnp.dot(h.astype(w2_ref.dtype), w2_ref[...],
                     preferred_element_type=jnp.float32) + b2_ref[...]
    out_ref[...] = logits.astype(out_ref.dtype)


def simple_nn_forward(x_nchw, w1, b1, w2, b2, *,
                      compute_dtype=jnp.bfloat16, tile_b=512):
    """x_nchw: (B, 1, 28, 28) f32. w1: (784,128), b1: (128,),
    w2: (128,10), b2: (10,). Returns (logits (B,10) f32, feat (B,128) f32)."""
    B = x_nchw.shape[0]
    x = x_nchw.reshape(B, D_IN)

    # Batch tile: multiple of 8 (sublane), capped at tile_b; pad B to a
    # multiple of TB with zero rows (sliced off afterwards).
    TB = max(8, min(tile_b, _round_up(B, 8)))
    B_pad = _round_up(B, TB)

    # Zero-pad K (784 -> 896) and batch, cast matmul operands to bf16.
    x_p = jnp.zeros((B_pad, D_IN_PAD), compute_dtype)
    x_p = x_p.at[:B, :D_IN].set(x.astype(compute_dtype))
    w1_p = jnp.zeros((D_IN_PAD, HIDDEN), compute_dtype)
    w1_p = w1_p.at[:D_IN, :].set(w1.astype(compute_dtype))
    # Zero-pad fc2 output dim (10 -> 128) for lane-dense stores.
    w2_p = jnp.zeros((HIDDEN, D_OUT_PAD), compute_dtype)
    w2_p = w2_p.at[:, :D_OUT].set(w2.astype(compute_dtype))
    b1_2d = b1.reshape(1, HIDDEN).astype(jnp.float32)
    b2_2d = jnp.zeros((1, D_OUT_PAD), jnp.float32).at[0, :D_OUT].set(
        b2.astype(jnp.float32))

    num_tiles = B_pad // TB
    itemsize = jnp.dtype(compute_dtype).itemsize
    cost = pl.CostEstimate(
        flops=2 * B_pad * D_IN_PAD * HIDDEN + 2 * B_pad * HIDDEN * D_OUT_PAD,
        transcendentals=0,
        bytes_accessed=(B_pad * D_IN_PAD * itemsize            # x
                        + D_IN_PAD * HIDDEN * itemsize         # w1
                        + HIDDEN * D_OUT_PAD * itemsize        # w2
                        + (HIDDEN + D_OUT_PAD) * 4             # biases
                        + B_pad * HIDDEN * 4                   # feat out
                        + B_pad * D_OUT_PAD * 4))              # logits out

    grid_spec = pltpu.PrefetchScalarGridSpec(
        num_scalar_prefetch=0,
        grid=(num_tiles,),
        in_specs=[
            pl.BlockSpec((TB, D_IN_PAD), lambda i: (i, 0)),      # x tile
            pl.BlockSpec((D_IN_PAD, HIDDEN), lambda i: (0, 0)),  # w1 resident
            pl.BlockSpec((1, HIDDEN), lambda i: (0, 0)),         # b1 resident
            pl.BlockSpec((HIDDEN, D_OUT_PAD), lambda i: (0, 0)),  # w2 resident
            pl.BlockSpec((1, D_OUT_PAD), lambda i: (0, 0)),      # b2 resident
        ],
        out_specs=[
            pl.BlockSpec((TB, D_OUT_PAD), lambda i: (i, 0)),     # logits slab
            pl.BlockSpec((TB, HIDDEN), lambda i: (i, 0)),        # feat
        ],
    )

    logits_pad, feat_pad = pl.pallas_call(
        mlp_kernel,
        out_shape=(
            jax.ShapeDtypeStruct((B_pad, D_OUT_PAD), jnp.float32),
            jax.ShapeDtypeStruct((B_pad, HIDDEN), jnp.float32),
        ),
        grid_spec=grid_spec,
        compiler_params=pltpu.CompilerParams(
            dimension_semantics=("parallel",)),
        cost_estimate=cost,
    )(x_p, w1_p, b1_2d, w2_p, b2_2d)

    return logits_pad[:B, :D_OUT], feat_pad[:B, :]


if __name__ == "__main__":
    key = jax.random.PRNGKey(0)
    k_x, k_w1, k_b1, k_w2, k_b2 = jax.random.split(key, 5)

    B = 8
    # Deterministic parameter init (uniform, roughly matching nn.Linear scale).
    bound1 = 1.0 / jnp.sqrt(784.0)
    bound2 = 1.0 / jnp.sqrt(128.0)
    w1 = jax.random.uniform(k_w1, (784, 128), jnp.float32, -bound1, bound1)
    b1 = jax.random.uniform(k_b1, (128,), jnp.float32, -bound1, bound1)
    w2 = jax.random.uniform(k_w2, (128, 10), jnp.float32, -bound2, bound2)
    b2 = jax.random.uniform(k_b2, (10,), jnp.float32, -bound2, bound2)

    x = jax.random.normal(k_x, (B, 1, 28, 28), jnp.float32)  # NCHW like PyTorch

    logits, feat = simple_nn_forward(x, w1, b1, w2, b2)
    jax.block_until_ready((logits, feat))
    assert logits.shape == (B, 10) and feat.shape == (B, 128)

    # Reference with the same bf16 operand rounding, f32 accumulation.
    xf = x.reshape(B, 784)
    bf = lambda a: a.astype(jnp.bfloat16).astype(jnp.float32)
    feat_ref = bf(xf) @ bf(w1) + b1
    logits_ref = bf(jnp.maximum(feat_ref, 0.0)) @ bf(w2) + b2
    assert jnp.allclose(feat, feat_ref, atol=1e-3, rtol=1e-3)
    assert jnp.allclose(logits, logits_ref, atol=1e-3, rtol=1e-3)

    # Sanity vs. full-precision reference (bf16 input rounding only).
    feat_f32 = xf @ w1 + b1
    logits_f32 = jnp.maximum(feat_f32, 0.0) @ w2 + b2
    assert jnp.allclose(feat, feat_f32, atol=5e-2, rtol=5e-2)
    assert jnp.allclose(logits, logits_f32, atol=5e-2, rtol=5e-2)

    print("KERNEL_OK")
</pallas_src>

<mosaic_0001>
module attributes {stable_mosaic.version = 11 : i64} {
  func.func @mlp_kernel(%arg0: i32, %arg1: memref<8x896xbf16, #tpu.memory_space<vmem>>, %arg2: memref<896x128xbf16, #tpu.memory_space<vmem>>, %arg3: memref<1x128xf32, #tpu.memory_space<vmem>>, %arg4: memref<128x128xbf16, #tpu.memory_space<vmem>>, %arg5: memref<1x128xf32, #tpu.memory_space<vmem>>, %arg6: memref<8x128xf32, #tpu.memory_space<vmem>>, %arg7: memref<8x128xf32, #tpu.memory_space<vmem>>) attributes {dimension_semantics = [#tpu.dimension_semantics<parallel>], iteration_bounds = array<i64: 1>, scalar_prefetch = 0 : i64, scratch_operands = 0 : i64, tpu.core_type = #tpu.core_type<tc>, window_params = [{transform_indices = @transform_0, window_bounds = array<i64: 8, 896>}, {pipeline_mode = #tpu.pipeline_mode<synchronous>, transform_indices = @transform_1, window_bounds = array<i64: 896, 128>}, {pipeline_mode = #tpu.pipeline_mode<synchronous>, transform_indices = @transform_2, window_bounds = array<i64: 1, 128>}, {pipeline_mode = #tpu.pipeline_mode<synchronous>, transform_indices = @transform_3, window_bounds = array<i64: 128, 128>}, {pipeline_mode = #tpu.pipeline_mode<synchronous>, transform_indices = @transform_4, window_bounds = array<i64: 1, 128>}, {transform_indices = @transform_5, window_bounds = array<i64: 8, 128>}, {transform_indices = @transform_6, window_bounds = array<i64: 8, 128>}]} {
    %c0 = arith.constant 0 : index
    %c0_0 = arith.constant 0 : index
    %0 = vector.load %arg1[%c0, %c0_0] : memref<8x896xbf16, #tpu.memory_space<vmem>>, vector<8x896xbf16>
    %c0_1 = arith.constant 0 : index
    %c0_2 = arith.constant 0 : index
    %1 = vector.load %arg2[%c0_1, %c0_2] : memref<896x128xbf16, #tpu.memory_space<vmem>>, vector<896x128xbf16>
    %cst = arith.constant dense<0.000000e+00> : vector<8x128xf32>
    %2 = tpu.matmul %0, %1, %cst {dimension_numbers = #tpu.dot_dimension_numbers<[1], [0], [0], [1], [0, 0, 1, 1], [], []>} : vector<8x896xbf16>, vector<896x128xbf16>, vector<8x128xf32> -> vector<8x128xf32>
    %c0_3 = arith.constant 0 : index
    %c0_4 = arith.constant 0 : index
    %3 = vector.load %arg3[%c0_3, %c0_4] : memref<1x128xf32, #tpu.memory_space<vmem>>, vector<1x128xf32>
    %4 = vector.broadcast %3 : vector<1x128xf32> to vector<8x128xf32>
    %5 = arith.addf %2, %4 : vector<8x128xf32>
    %c0_5 = arith.constant 0 : index
    %c0_6 = arith.constant 0 : index
    %6 = vector.load %arg7[%c0_5, %c0_6] : memref<8x128xf32, #tpu.memory_space<vmem>>, vector<8x128xf32>
    tpu.vector_store %arg7[%c0_5, %c0_6], %5 {strides = array<i32>} : memref<8x128xf32, #tpu.memory_space<vmem>>, vector<8x128xf32>,
    %cst_7 = arith.constant 0.000000e+00 : f32
    %7 = vector.broadcast %cst_7 : f32 to vector<8x128xf32>
    %8 = arith.maximumf %5, %7 : vector<8x128xf32>
    %9 = arith.truncf %8 : vector<8x128xf32> to vector<8x128xbf16>
    %c0_8 = arith.constant 0 : index
    %c0_9 = arith.constant 0 : index
    %10 = vector.load %arg4[%c0_8, %c0_9] : memref<128x128xbf16, #tpu.memory_space<vmem>>, vector<128x128xbf16>
    %cst_10 = arith.constant dense<0.000000e+00> : vector<8x128xf32>
    %11 = tpu.matmul %9, %10, %cst_10 {dimension_numbers = #tpu.dot_dimension_numbers<[1], [0], [0], [1], [0, 0, 1, 1], [], []>} : vector<8x128xbf16>, vector<128x128xbf16>, vector<8x128xf32> -> vector<8x128xf32>
    %c0_11 = arith.constant 0 : index
    %c0_12 = arith.constant 0 : index
    %12 = vector.load %arg5[%c0_11, %c0_12] : memref<1x128xf32, #tpu.memory_space<vmem>>, vector<1x128xf32>
    %13 = vector.broadcast %12 : vector<1x128xf32> to vector<8x128xf32>
    %14 = arith.addf %11, %13 : vector<8x128xf32>
    %c0_13 = arith.constant 0 : index
    %c0_14 = arith.constant 0 : index
    %15 = vector.load %arg6[%c0_13, %c0_14] : memref<8x128xf32, #tpu.memory_space<vmem>>, vector<8x128xf32>
    tpu.vector_store %arg6[%c0_13, %c0_14], %14 {strides = array<i32>} : memref<8x128xf32, #tpu.memory_space<vmem>>, vector<8x128xf32>,
    return
  }
  func.func @transform_0(%arg0: i32) -> (i32, i32) {
    %c0_i32 = arith.constant 0 : i32
    %c0_i32_0 = arith.constant 0 : i32
    return %arg0, %c0_i32 : i32, i32
  }
  func.func @transform_1(%arg0: i32) -> (i32, i32) {
    %c0_i32 = arith.constant 0 : i32
    %c0_i32_0 = arith.constant 0 : i32
    %c0_i32_1 = arith.constant 0 : i32
    return %c0_i32, %c0_i32_0 : i32, i32
  }
  func.func @transform_2(%arg0: i32) -> (i32, i32) {
    %c0_i32 = arith.constant 0 : i32
    %c0_i32_0 = arith.constant 0 : i32
    %c0_i32_1 = arith.constant 0 : i32
    return %c0_i32, %c0_i32_0 : i32, i32
  }
  func.func @transform_3(%arg0: i32) -> (i32, i32) {
    %c0_i32 = arith.constant 0 : i32
    %c0_i32_0 = arith.constant 0 : i32
    %c0_i32_1 = arith.constant 0 : i32
    return %c0_i32, %c0_i32_0 : i32, i32
  }
  func.func @transform_4(%arg0: i32) -> (i32, i32) {
    %c0_i32 = arith.constant 0 : i32
    %c0_i32_0 = arith.constant 0 : i32
    %c0_i32_1 = arith.constant 0 : i32
    return %c0_i32, %c0_i32_0 : i32, i32
  }
  func.func @transform_5(%arg0: i32) -> (i32, i32) {
    %c0_i32 = arith.constant 0 : i32
    %c0_i32_0 = arith.constant 0 : i32
    return %arg0, %c0_i32 : i32, i32
  }
  func.func @transform_6(%arg0: i32) -> (i32, i32) {
    %c0_i32 = arith.constant 0 : i32
    %c0_i32_0 = arith.constant 0 : i32
    return %arg0, %c0_i32 : i32, i32
  }
}

</mosaic_0001>

<bundles_post_ra>
// kernel: tpu_custom_call.1
= control target key start
LH: loop header
LB: loop body
LE: loop exit
PB: predicated region body
PF: predicated region fallthrough
CT: control target
= control target key end

     0   :  { %12 = vsyncpa [#allocation3], 0  ;;  %s1384_s0 = inlined_call_operand.hbm [shape: bf16[8,896], index: 0, kind: input, shape index: {}]   ;;  %s1385_s1 = inlined_call_operand.hbm [shape: bf16[896,128], index: 1, kind: input, shape index: {}]   ;;  %s1386_s2 = inlined_call_operand.vmem [shape: f32[1,128], index: 2, kind: input, shape index: {}]   ;;  %s1387_s3 = inlined_call_operand.hbm [shape: bf16[128,128], index: 3, kind: input, shape index: {}]   ;;  %s1388_s4 = inlined_call_operand.vmem [shape: f32[1,128], index: 4, kind: input, shape index: {}]   ;;  %s1389_s5 = inlined_call_operand.hbm [shape: f32[8,128], index: 5, kind: output, shape index: {0}]   ;;  %s1390_s6 = inlined_call_operand.hbm [shape: f32[8,128], index: 6, kind: output, shape index: {1}]  }
   0x1   :  { %13 = vsyncpa [#allocation6], 0 }
   0x2   :  { %14 = vsyncpa [#allocation4], 0 }
   0x3   :  { %15 = vsyncpa [#allocation10], 0  ;;  %s1248_s21 = smov [#allocation5]   ;;  %s1130_s25 = scalar_lea.hbm %s1385_s1, 7168 }
   0x4   :  { %s31_s22 = sshll.u32 %s1248_s21, 4  ;;  %p1131_p0 = scmp.ne.s32.totalorder %s1385_s1, %s1130_s25  ;;  %s32_s22 = int_to_ptr.vmem [resolvable:$true] %s31_s22 }
   0x5   :  { %p1134_p1 = scmp.lt.u32.totalorder %s1130_s25, %s1385_s1 }
   0x7   :  { %p1136_p2 = pnand %p1134_p1, %p1131_p0 }
   0x9   :  { %1139 = shalt.err (!%p1136_p2)
}
   0xa   :  { %s1140_s30 = scalar_lea.vmem %s32_s22, 7168  ;;  %p1145_p4 = scmp.lt.s32.totalorder %s32_s22, %s32_s22 }
   0xb   :  { %p1141_p3 = scmp.ne.s32.totalorder %s32_s22, %s1140_s30  ;;  %p1146_p5 = scmp.lt.s32.totalorder %s1140_s30, %s1140_s30 }
   0xd   :  { %p1147_p6 = por %p1146_p5, %p1145_p4 }
   0xf   :  { %p1148_p7 = pnand %p1147_p6, %p1141_p3 }
  0x11   :  { %1151 = shalt.err (!%p1148_p7)
}
  0x12   :  { %s1249_s7 = smov 64   ;;  %s1250_s8 = smov 4  }
  0x13   :  { %37 = dma.hbm_to_vmem [thread:$0]  %s1385_s1, 7168, %s32_s22, [#allocation6], %s1249_s7, %s1249_s7, %s1250_s8  }
  0x14   :  { %s1251_s11 = smov [#allocation2]   ;;  %s1252_s13 = smov [#allocation7]  }
  0x15   :  { %s22_s12 = sshll.u32 %s1251_s11, 4  ;;  %s45_s14 = sshll.u32 %s1252_s13, 4  ;;  %s23_s12 = int_to_ptr.vmem [resolvable:$true] %s22_s12  ;;  %s46_s14 = int_to_ptr.vmem [resolvable:$true] %s45_s14 }
  0x16   :  { %s1152_s17 = scalar_lea.hbm %s1384_s0, 448 }
  0x17   :  { %p1153_p8 = scmp.ne.s32.totalorder %s1384_s0, %s1152_s17  ;;  %p1156_p9 = scmp.lt.u32.totalorder %s1152_s17, %s1384_s0 }
  0x19   :  { %p1158_p10 = pnand %p1156_p9, %p1153_p8 }
  0x1b   :  { %1161 = shalt.err (!%p1158_p10)
}
  0x1c   :  { %s1162_s1 = scalar_lea.vmem %s23_s12, 448  ;;  %p1167_p12 = scmp.lt.s32.totalorder %s23_s12, %s23_s12 }
  0x1d   :  { %p1163_p11 = scmp.ne.s32.totalorder %s23_s12, %s1162_s1  ;;  %p1168_p13 = scmp.lt.s32.totalorder %s1162_s1, %s1162_s1 }
  0x1f   :  { %p1169_p0 = por %p1168_p13, %p1167_p12 }
  0x21   :  { %p1170_p1 = pnand %p1169_p0, %p1163_p11 }
  0x23   :  { %1173 = shalt.err (!%p1170_p1)
}
  0x24   :  { %25 = dma.hbm_to_vmem [thread:$0]  %s1384_s0, 448, %s23_s12, [#allocation3]  }
  0x25   :  { %s1174_s26 = scalar_lea.hbm %s1387_s3, 1024 }
  0x26   :  { %p1175_p2 = scmp.ne.s32.totalorder %s1387_s3, %s1174_s26  ;;  %p1178_p3 = scmp.lt.u32.totalorder %s1174_s26, %s1387_s3 }
  0x28   :  { %p1180_p4 = pnand %p1178_p3, %p1175_p2 }
  0x2a   :  { %1183 = shalt.err (!%p1180_p4)
}
  0x2b   :  { %s1184_s9 = scalar_lea.vmem %s46_s14, 1024  ;;  %p1189_p6 = scmp.lt.s32.totalorder %s46_s14, %s46_s14 }
  0x2c   :  { %p1185_p5 = scmp.ne.s32.totalorder %s46_s14, %s1184_s9  ;;  %p1190_p7 = scmp.lt.s32.totalorder %s1184_s9, %s1184_s9 }
  0x2e   :  { %p1191_p8 = por %p1190_p7, %p1189_p6 }
  0x30   :  { %p1192_p9 = pnand %p1191_p8, %p1185_p5 }
  0x32   :  { %1195 = shalt.err (!%p1192_p9)
}
  0x33   :  { %51 = dma.hbm_to_vmem [thread:$0]  %s1387_s3, 1024, %s46_s14, [#allocation6], %s1249_s7, %s1249_s7, %s1250_s8  }
  0x34   :  { %1240 = dma.done.wait [#allocation3], 448  }
  0x35   :  { %1241 = vsyncadd [#allocation3], 4294966848 }
  0x36   :  { %1242 = dma.done.wait [#allocation6], 8192  }
  0x37   :  { %1243 = vsyncadd [#allocation6], 4294959104  ;;  %v1059_v0 = vld [vmem:[#allocation5 + $0x40] sm:$0xff]   ;;  %v1063_v4 = vld [vmem:[#allocation5 + $0x48] sm:$0xff]   ;;  %v1253_v42 = vmov 0.0   ;;  %vm1254_vm0 = vmmov 0  }
  0x38   :  { %v1060_v1 = vld [vmem:[#allocation5] sm:$0xff]   ;;  %926 = vmatprep.subr.bf16.mxu0 %v1059_v0  ;;  %v1064_v5 = vld [vmem:[#allocation5 + $0x8] sm:$0xff]   ;;  %v1067_v8 = vld [vmem:[#allocation5 + $0x50] sm:$0xff]  }
  0x39   :  { %v1061_v2 = vld [vmem:[#allocation5 + $0xc0] sm:$0xff]   ;;  %927 = vmatpush3.bf16.msra.mxu0 %v1060_v1  ;;  %v1065_v6 = vld [vmem:[#allocation5 + $0xc8] sm:$0xff]   ;;  %v1068_v9 = vld [vmem:[#allocation5 + $0x10] sm:$0xff]  }
  0x3a   :  { %v1062_v3 = vld [vmem:[#allocation5 + $0x80] sm:$0xff]   ;;  %948 = vmatprep.subr.bf16.mxu1 %v1061_v2  ;;  %928 = vmatprep.subr.bf16.mxu0 %v1063_v4  ;;  %v1066_v7 = vld [vmem:[#allocation5 + $0x88] sm:$0xff]   ;;  %v1069_v10 = vld [vmem:[#allocation5 + $0xd0] sm:$0xff]  }
  0x3b   :  { %949 = vmatpush3.bf16.msra.mxu1 %v1062_v3  ;;  %v1070_v11 = vld [vmem:[#allocation5 + $0x90] sm:$0xff]   ;;  %v1071_v12 = vld [vmem:[#allocation5 + $0x58] sm:$0xff]   ;;  %v1075_v16 = vld [vmem:[#allocation5 + $0x60] sm:$0xff]  }
  0x3c   :  { %950 = vmatprep.subr.bf16.mxu1 %v1065_v6  ;;  %v1072_v13 = vld [vmem:[#allocation5 + $0x18] sm:$0xff]   ;;  %v1076_v17 = vld [vmem:[#allocation5 + $0x20] sm:$0xff]   ;;  %v1079_v20 = vld [vmem:[#allocation5 + $0x68] sm:$0xff]  }
  0x3d   :  { %929 = vmatpush3.bf16.msra.mxu0 %v1064_v5  ;;  %v1073_v14 = vld [vmem:[#allocation5 + $0xd8] sm:$0xff]   ;;  %v1077_v18 = vld [vmem:[#allocation5 + $0xe0] sm:$0xff]   ;;  %v1080_v21 = vld [vmem:[#allocation5 + $0x28] sm:$0xff]  }
  0x3e   :  { %930 = vmatprep.subr.bf16.mxu0 %v1067_v8  ;;  %v1074_v15 = vld [vmem:[#allocation5 + $0x98] sm:$0xff]   ;;  %v1078_v19 = vld [vmem:[#allocation5 + $0xa0] sm:$0xff]   ;;  %v1081_v22 = vld [vmem:[#allocation5 + $0xe8] sm:$0xff]  }
  0x3f   :  { %951 = vmatpush3.bf16.msra.mxu1 %v1066_v7  ;;  %v1082_v23 = vld [vmem:[#allocation5 + $0xa8] sm:$0xff]   ;;  %v1083_v24 = vld [vmem:[#allocation5 + $0x70] sm:$0xff]   ;;  %v1087_v28 = vld [vmem:[#allocation5 + $0x78] sm:$0xff]  }
  0x40   :  { %952 = vmatprep.subr.bf16.mxu1 %v1069_v10  ;;  %v1084_v25 = vld [vmem:[#allocation5 + $0x30] sm:$0xff]   ;;  %v1088_v29 = vld [vmem:[#allocation5 + $0x38] sm:$0xff]   ;;  %v64_v31 = vld [vmem:[#allocation2] sm:$0xff] }
  0x41   :  { %931 = vmatpush3.bf16.msra.mxu0 %v1068_v9  ;;  %v1085_v26 = vld [vmem:[#allocation5 + $0xf0] sm:$0xff]   ;;  %v1089_v30 = vld [vmem:[#allocation5 + $0xf8] sm:$0xff]   ;;  %v854_v32 = vcombine.low %v64_v31, %v64_v31  ;;  %v855_v33 = vcombine.high %v64_v31, %v64_v31  ;;  %v1093_v35 = vld [vmem:[#allocation5 + $0x140] sm:$0xff]  }
  0x42   :  { %932 = vmatprep.subr.bf16.mxu0 %v1071_v12  ;;  %v1086_v27 = vld [vmem:[#allocation5 + $0xb0] sm:$0xff]   ;;  %v1092_v34 = vld [vmem:[#allocation5 + $0xb8] sm:$0xff]   ;;  %v1096_v39 = vld [vmem:[#allocation5 + $0x100] sm:$0xff]  }
  0x43   :  { %953 = vmatpush3.bf16.msra.mxu1 %v1070_v11  ;;  %v65_v36 = vld [vmem:[#allocation2 + $0x8] sm:$0xff]  ;;  %580 = vmatprep.mubr.bf16.mxu0 %v855_v33  ;;  %v1097_v40 = vld [vmem:[#allocation5 + $0x180] sm:$0xff]   ;;  %v1104_v48 = vld [vmem:[#allocation5 + $0x158] sm:$0xff]  }
  0x44   :  { %954 = vmatprep.subr.bf16.mxu1 %v1073_v14  ;;  %v856_v37 = vcombine.low %v65_v36, %v65_v36  ;;  %v857_v38 = vcombine.high %v65_v36, %v65_v36  ;;  %v1098_v41 = vld [vmem:[#allocation5 + $0x148] sm:$0xff]   ;;  %v1101_v45 = vld [vmem:[#allocation5 + $0x150] sm:$0xff]   ;;  %v1105_v49 = vld [vmem:[#allocation5 + $0x118] sm:$0xff]  }
  0x45   :  { %933 = vmatpush3.bf16.msra.mxu0 %v1072_v13  ;;  %v1099_v43 = vld [vmem:[#allocation5 + $0x108] sm:$0xff]   ;;  %v1102_v46 = vld [vmem:[#allocation5 + $0x110] sm:$0xff]   ;;  %v1107_v50 = vld [vmem:[#allocation5 + $0x160] sm:$0xff]  }
  0x46   :  { %934 = vmatprep.subr.bf16.mxu0 %v1075_v16  ;;  %620 = vmatprep.mubr.bf16.mxu1 %v857_v38  ;;  %v1100_v44 = vld [vmem:[#allocation5 + $0x188] sm:$0xff]   ;;  %v1103_v47 = vld [vmem:[#allocation5 + $0x190] sm:$0xff]   ;;  %v1106_v51 = vld [vmem:[#allocation5 + $0x198] sm:$0xff]  }
  0x47   :  { %955 = vmatpush3.bf16.msra.mxu1 %v1074_v15  ;;  %v1108_v52 = vld [vmem:[#allocation5 + $0x120] sm:$0xff]   ;;  %v1110_v53 = vld [vmem:[#allocation5 + $0x168] sm:$0xff]   ;;  %v1113_v56 = vld [vmem:[#allocation5 + $0x170] sm:$0xff]  }
  0x48   :  { %956 = vmatprep.subr.bf16.mxu1 %v1077_v18  ;;  %v1109_v54 = vld [vmem:[#allocation5 + $0x1a0] sm:$0xff]   ;;  %v1111_v55 = vld [vmem:[#allocation5 + $0x128] sm:$0xff]   ;;  %v1114_v58 = vld [vmem:[#allocation5 + $0x130] sm:$0xff]  }
  0x49   :  { %935 = vmatpush3.bf16.msra.mxu0 %v1076_v17  ;;  %v1112_v57 = vld [vmem:[#allocation5 + $0x1a8] sm:$0xff]   ;;  %v66_v59 = vld [vmem:[#allocation2 + $0x10] sm:$0xff]  ;;  %v1121_v2 = vld [vmem:[#allocation2 + $0x18] ss:$0 sps:$4 sm:$0xff]  }
  0x4a   :  { %936 = vmatprep.subr.bf16.mxu0 %v1079_v20  ;;  %v1115_v60 = vld [vmem:[#allocation5 + $0x1b0] sm:$0xff]   ;;  %v859_v61 = vcombine.high %v66_v59, %v66_v59  ;;  %v1116_v62 = vld [vmem:[#allocation5 + $0x178] sm:$0xff]   ;;  %v858_v1 = vcombine.low %v66_v59, %v66_v59  ;;  %v1122_v3 = vld [vmem:[#allocation7] sm:$0xff]  }
  0x4b   :  { %957 = vmatpush3.bf16.msra.mxu1 %v1078_v19  ;;  %v1117_v63 = vld [vmem:[#allocation5 + $0x138] sm:$0xff]   ;;  %v1123_v4 = vld [vmem:[#allocation7 + $0x8] sm:$0xff]   ;;  %v1124_v5 = vld [vmem:[#allocation7 + $0x10] sm:$0xff]  }
  0x4c   :  { %958 = vmatprep.subr.bf16.mxu1 %v1081_v22  ;;  %v1120_v0 = vld [vmem:[#allocation5 + $0x1b8] sm:$0xff]   ;;  %v1126_v7 = vld [vmem:[#allocation7 + $0x20] sm:$0xff]   ;;  %v1127_v8 = vld [vmem:[#allocation7 + $0x28] sm:$0xff]  }
  0x4d   :  { %937 = vmatpush3.bf16.msra.mxu0 %v1080_v21  ;;  %v1125_v6 = vld [vmem:[#allocation7 + $0x18] sm:$0xff]   ;;  %v1128_v9 = vld [vmem:[#allocation7 + $0x30] sm:$0xff]   ;;  %v853_v12 = vld [vmem:[%s1386_s2] ss:$0 sm:$0xff]  ;;  %s1255_s2 = smov [#allocation9]  }
  0x4e   :  { %938 = vmatprep.subr.bf16.mxu0 %v1083_v24  ;;  %v1129_v10 = vld [vmem:[#allocation7 + $0x38] sm:$0xff]   ;;  %s839_s8 = sshll.u32 %s1255_s2, 4  ;;  %s840_s8 = int_to_ptr.vmem [resolvable:$true] %s839_s8 }
  0x4f   :  { %959 = vmatpush3.bf16.msra.mxu1 %v1082_v23  ;;  %s1196_s11 = scalar_lea.vmem %s840_s8, 128  ;;  %p1201_p11 = scmp.lt.s32.totalorder %s840_s8, %s840_s8 }
  0x50   :  { %960 = vmatprep.subr.bf16.mxu1 %v1085_v26  ;;  %p1197_p10 = scmp.ne.s32.totalorder %s840_s8, %s1196_s11  ;;  %p1202_p12 = scmp.lt.s32.totalorder %s1196_s11, %s1196_s11 }
  0x51   :  { %939 = vmatpush3.bf16.msra.mxu0 %v1084_v25 }
  0x52   :  { %940 = vmatprep.subr.bf16.mxu0 %v1087_v28  ;;  %p1203_p13 = por %p1202_p12, %p1201_p11 }
  0x53   :  { %961 = vmatpush3.bf16.msra.mxu1 %v1086_v27 }
  0x54   :  { %962 = vmatprep.subr.bf16.mxu1 %v1089_v30  ;;  %p1204_p0 = pnand %p1203_p13, %p1197_p10 }
  0x55   :  { %941 = vmatpush3.bf16.msra.mxu0 %v1088_v29 }
  0x56   :  { %970 = vmatprep.subr.bf16.mxu0 %v1093_v35 }
  0x57   :  { %963 = vmatpush3.bf16.msra.mxu1 %v1092_v34 }
  0x58   :  { %581 = vmatmul.mubr.bf16.vlgmr.msra.gmra.mrb[0].mxu0 %v854_v32  ;;  %1010 = vmatprep.subr.bf16.mxu1 %v1253_v42 }
  0x59   :  { %971 = vmatpush3.bf16.msra.mxu0 %v1096_v39  ;;  %660 = vmatprep.mubr.bf16.mxu0 %v859_v61 }
  0x5a   :  { %621 = vmatmul.mubr.bf16.vlgmr.msra.gmra.mrb[0].mxu1 %v856_v37  ;;  %972 = vmatprep.subr.bf16.mxu0 %v1098_v41 }
  0x5b   :  { %1011 = vmatpush3.bf16.msra.mxu1 %v1097_v40  ;;  %1026 = vmatprep.mubr.msk.bf16.mxu1 %vm1254_vm0, %v1253_v42 }
  0x5c   :  { %1012 = vmatprep.subr.bf16.mxu1 %v1253_v42 }
  0x5d   :  { %973 = vmatpush3.bf16.msra.mxu0 %v1099_v43 }
  0x5e   :  { %974 = vmatprep.subr.bf16.mxu0 %v1101_v45 }
  0x5f   :  { %1013 = vmatpush3.bf16.msra.mxu1 %v1100_v44 }
  0x60   :  { %1014 = vmatprep.subr.bf16.mxu1 %v1253_v42 }
  0x61   :  { %975 = vmatpush3.bf16.msra.mxu0 %v1102_v46 }
  0x62   :  { %976 = vmatprep.subr.bf16.mxu0 %v1104_v48 }
  0x63   :  { %1015 = vmatpush3.bf16.msra.mxu1 %v1103_v47 }
  0x64   :  { %1016 = vmatprep.subr.bf16.mxu1 %v1253_v42 }
  0x65   :  { %977 = vmatpush3.bf16.msra.mxu0 %v1105_v49 }
  0x66   :  { %978 = vmatprep.subr.bf16.mxu0 %v1107_v50 }
  0x67   :  { %1017 = vmatpush3.bf16.msra.mxu1 %v1106_v51 }
  0x68   :  { %1018 = vmatprep.subr.bf16.mxu1 %v1253_v42 }
  0x69   :  { %979 = vmatpush3.bf16.msra.mxu0 %v1108_v52 }
  0x6a   :  { %980 = vmatprep.subr.bf16.mxu0 %v1110_v53 }
  0x6b   :  { %1019 = vmatpush3.bf16.msra.mxu1 %v1109_v54 }
  0x6c   :  { %1020 = vmatprep.subr.bf16.mxu1 %v1253_v42 }
  0x6d   :  { %981 = vmatpush3.bf16.msra.mxu0 %v1111_v55 }
  0x6e   :  { %982 = vmatprep.subr.bf16.mxu0 %v1113_v56 }
  0x6f   :  { %1021 = vmatpush3.bf16.msra.mxu1 %v1112_v57 }
  0x70   :  { %1022 = vmatprep.subr.bf16.mxu1 %v1253_v42 }
  0x71   :  { %983 = vmatpush3.bf16.msra.mxu0 %v1114_v58 }
  0x72   :  { %984 = vmatprep.subr.bf16.mxu0 %v1116_v62 }
  0x73   :  { %1023 = vmatpush3.bf16.msra.mxu1 %v1115_v60 }
  0x74   :  { %1024 = vmatprep.subr.bf16.mxu1 %v1253_v42 }
  0x75   :  { %985 = vmatpush3.bf16.msra.mxu0 %v1117_v63 }
  0x76   :  { %1030 = vmatprep.subr.bf16.mxu0 %v1253_v42 }
  0x77   :  { %1025 = vmatpush3.bf16.msra.mxu1 %v1120_v0 }
  0x78   :  { %661 = vmatmul.mubr.bf16.vlgmr.msra.gmra.mrb[4].mxu0 %v858_v1 }
  0x79   :  { %1046 = vmatprep.mubr.msk.bf16.mxu0 %vm1254_vm0, %v1253_v42  ;;  %1031 = vmatpush3.bf16.msra.mxu0 %v1122_v3 }
  0x7a   :  { %1027 = vmatmul.mubr.bf16.vlgmr.msra.gmra.mrb[4].mxu1 %v1121_v2  ;;  %1032 = vmatprep.subr.bf16.mxu0 %v1253_v42 }
  0x7d   :  { %1033 = vmatpush3.bf16.msra.mxu0 %v1123_v4 }
  0x7e   :  { %1034 = vmatprep.subr.bf16.mxu0 %v1253_v42 }
  0x81   :  { %1035 = vmatpush3.bf16.msra.mxu0 %v1124_v5 }
  0x82   :  { %1036 = vmatprep.subr.bf16.mxu0 %v1253_v42 }
  0x85   :  { %1037 = vmatpush3.bf16.msra.mxu0 %v1125_v6 }
  0x86   :  { %1038 = vmatprep.subr.bf16.mxu0 %v1253_v42 }
  0x89   :  { %1039 = vmatpush3.bf16.msra.mxu0 %v1126_v7 }
  0x8a   :  { %1040 = vmatprep.subr.bf16.mxu0 %v1253_v42 }
  0x8d   :  { %1041 = vmatpush3.bf16.msra.mxu0 %v1127_v8 }
  0x8e   :  { %1042 = vmatprep.subr.bf16.mxu0 %v1253_v42 }
  0x91   :  { %1043 = vmatpush3.bf16.msra.mxu0 %v1128_v9 }
  0x92   :  { %1044 = vmatprep.subr.bf16.mxu0 %v1253_v42 }
  0x95   :  { %1045 = vmatpush3.bf16.msra.mxu0 %v1129_v10 }
 0x12b   :  { %v942_v11 = vpop.f32.mrb[0].mxu0 }
 0x12c   :  { %v943_v13 = vpop.f32.mrb[1].mxu0 }
 0x12d   :  { %v944_v14 = vadd.f32 %v943_v13, %v942_v11  ;;  %v945_v15 = vpop.f32.mrb[2].mxu0  ;;  %v964_v16 = vpop.f32.mrb[0].mxu1 }
 0x12e   :  { %v946_v17 = vpop.f32.mrb[3].mxu0  ;;  %v965_v18 = vpop.f32.mrb[1].mxu1 }
 0x12f   :  { %v583_v19 = vadd.f32 %v944_v14, %v853_v12  ;;  %v966_v20 = vadd.f32 %v965_v18, %v964_v16  ;;  %v967_v21 = vpop.f32.mrb[2].mxu1 }
 0x130   :  { %v968_v22 = vpop.f32.mrb[3].mxu1 }
 0x131   :  { %v623_v23 = vadd.f32 %v966_v20, %v583_v19 }
 0x14b   :  { %v986_v24 = vpop.f32.mrb[4].mxu0 }
 0x14c   :  { %v987_v25 = vpop.f32.mrb[5].mxu0 }
 0x14d   :  { %v988_v26 = vadd.f32 %v987_v25, %v986_v24  ;;  %v989_v27 = vpop.f32.mrb[6].mxu0  ;;  %v702_v28 = vpop.f32.mrb[4].mxu1 }
 0x14e   :  { %v990_v29 = vpop.f32.mrb[7].mxu0  ;;  %v1028_v30 = vpop.f32.mrb[5].mxu1 }
 0x14f   :  { %v663_v31 = vadd.f32 %v988_v26, %v623_v23  ;;  %v705_v32 = vpop.f32.mrb[6].mxu1 }
 0x150   :  { %v1029_v33 = vpop.f32.mrb[7].mxu1 }
 0x151   :  { %v703_v34 = vadd.f32 %v702_v28, %v663_v31 }
 0x153   :  { %v709_v35 = vmax.f32 %v703_v34, 0.0  ;;  %708 = vst [vmem:[#allocation9] sm:$0xff] %v703_v34 }
 0x155   :  { %v710_v36 = vpack.c.bf16 %v709_v35, %v709_v35 }
 0x157   :  { %1047 = vmatmul.mubr.bf16.vlgmr.msra.gmra.mrb[8].mxu0 %v710_v36 }
 0x158   :  { %1207 = shalt.err (!%p1204_p0)
}
 0x159   :  { %s1208_s14 = scalar_lea.hbm %s1390_s6, 128 }
 0x15a   :  { %p1209_p1 = scmp.ne.s32.totalorder %s1390_s6, %s1208_s14  ;;  %p1212_p2 = scmp.lt.u32.totalorder %s1208_s14, %s1390_s6 }
 0x15c   :  { %p1214_p3 = pnand %p1212_p2, %p1209_p1 }
 0x15e   :  { %1217 = shalt.err (!%p1214_p3)
}
 0x15f   :  { %842 = dma.vmem_to_hbm [thread:$0]  %s840_s8, 128, %s1390_s6, [#allocation10]   ;;  %v917_v37 = vld [vmem:[%s1388_s4] ss:$0 sm:$0xff] }
 0x160   :  { %s1256_s22 = smov [#allocation8]  }
 0x161   :  { %s829_s23 = sshll.u32 %s1256_s22, 4  ;;  %s830_s23 = int_to_ptr.vmem [resolvable:$true] %s829_s23 }
 0x162   :  { %s1218_s24 = scalar_lea.vmem %s830_s23, 128  ;;  %p1223_p5 = scmp.lt.s32.totalorder %s830_s23, %s830_s23 }
 0x163   :  { %p1219_p4 = scmp.ne.s32.totalorder %s830_s23, %s1218_s24  ;;  %p1224_p6 = scmp.lt.s32.totalorder %s1218_s24, %s1218_s24 }
 0x165   :  { %p1225_p7 = por %p1224_p6, %p1223_p5 }
 0x167   :  { %p1226_p8 = pnand %p1225_p7, %p1219_p4 }
 0x22a   :  { %v816_v38 = vpop.f32.mrb[8].mxu0 }
 0x22b   :  { %v817_v39 = vadd.f32 %v917_v37, %v816_v38  ;;  %v1048_v40 = vpop.f32.mrb[9].mxu0 }
 0x22c   :  { %v819_v41 = vpop.f32.mrb[10].mxu0 }
 0x22d   :  { %822 = vst [vmem:[#allocation8] sm:$0xff] %v817_v39  ;;  %v1049_v42 = vpop.f32.mrb[11].mxu0 }
 0x22e   :  { %1229 = shalt.err (!%p1226_p8)
}
 0x22f   :  { %s1230_s4 = scalar_lea.hbm %s1389_s5, 128 }
 0x230   :  { %p1231_p9 = scmp.ne.s32.totalorder %s1389_s5, %s1230_s4  ;;  %p1234_p10 = scmp.lt.u32.totalorder %s1230_s4, %s1389_s5 }
 0x232   :  { %p1236_p11 = pnand %p1234_p10, %p1231_p9 }
 0x234   :  { %1239 = shalt.err (!%p1236_p11)
}
 0x235   :  { %832 = dma.vmem_to_hbm [thread:$0]  %s830_s23, 128, %s1389_s5, [#allocation4]  }
 0x236   :  { %1244 = dma.done.wait [#allocation4], 128  }
 0x237   :  { %1245 = vsyncadd [#allocation4], 4294967168 }
 0x238   :  { %1246 = dma.done.wait [#allocation10], 128  }
 0x239   :  { %1247 = vsyncadd [#allocation10], 4294967168 }
 0x23a   :  { %849 = vsyncpa [#allocation3], 1 }
 0x23b   :  { %850 = vsyncpa [#allocation6], 1 }
 0x23c   :  { %851 = vsyncpa [#allocation4], 1 }
 0x23d   :  { %852 = vsyncpa [#allocation10], 1 }

</bundles_post_ra>
